<compile_context>
chip_gen: v6e
topology: v6e:2x2x1
jax: 0.10.0
libtpu: 0.0.40
codegen_flags: <defaults>
</compile_context>

<pallas_src>
import jax
import jax.numpy as jnp
import numpy as np
from jax.experimental import pallas as pl
from jax.experimental.pallas import tpu as pltpu


# ---------------------------------------------------------------------------
# Budget / layout helpers
# ---------------------------------------------------------------------------

def _vmem_limit_bytes():
    """Generation-aware scoped-VMEM limit (don't reuse one constant)."""
    try:
        cap = int(pltpu.get_tpu_info().vmem_capacity_bytes)
    except Exception:
        cap = 128 * 1024 * 1024
    # -> 64 MiB on v5e/v6e (128 MiB physical), 32 MiB on v7x (64 MiB physical).
    return int(min(64 * 1024 * 1024, max(16 * 1024 * 1024, cap // 2)))


def _choose_layout(c_l, c_g, hw):
    """Pick a lane-dense view of each branch's (C_p, HW) plane.

    Returns (lane, fold, rpc); each branch is viewed as (N, R_p, lane) with
    R_p = C_p * HW // lane:
      fold == 1 : each channel owns `rpc` whole rows of width `lane`.
      fold  > 1 : `fold` channels share each 128-lane row, `hw` lanes apiece.
    """
    if hw % 128 == 0:
        return 128, 1, hw // 128
    if 128 % hw == 0:
        fold = 128 // hw
        if c_l % fold == 0 and c_g % fold == 0:
            return 128, fold, 1
    # TODO(synk): unaligned HW (e.g. 7x7) keeps HW on lanes -> masked partial
    # stores; padding HW to a multiple of 128 would need an extra HBM copy.
    return hw, 1, 1


def _choose_batch_block(n, per_batch_bytes, tile_cap):
    """Batch items per grid step.

    Largest block whose (read + write) tile fits `tile_cap`, capped so there
    are >= 2 grid steps when n >= 2 (so the "parallel" batch axis can shard
    across both v7x TensorCores).  Prefers a divisor of n (balanced steps) but
    falls back to a partial last block (Pallas clips it) when the best divisor
    would be much smaller than the byte cap (e.g. prime n).
    """
    if n <= 1:
        return 1
    cap = max(1, min(tile_cap // per_batch_bytes, -(-n // 2)))
    best_div = next(nb for nb in range(cap, 0, -1) if n % nb == 0)
    return best_div if best_div * 2 > cap else cap


def _row_slot_channel_index(c_p, fold, rpc):
    """(fold, R_p) map from (lane-slot f, row r) -> original channel index."""
    if fold > 1:
        r = np.arange(c_p // fold)
        f = np.arange(fold)
        return r[None, :] * fold + f[:, None]          # c = r * fold + f
    return (np.arange(c_p * rpc) // rpc)[None, :]      # c = r // rpc


def _pack_params(params, c_l, c_g, fold, rpc):
    """Re-index the 1x1-conv params to the kernel's (slot, row) layout."""
    w1, b1, wl, bl, wg, bg = params
    hidden = w1.shape[0]
    idx_l = _row_slot_channel_index(c_l, fold, rpc)
    idx_g = _row_slot_channel_index(c_g, fold, rpc)
    w1t = jnp.transpose(w1)                                           # (C, hidden)
    w1_pack = jnp.concatenate([w1t[:c_l][idx_l], w1t[c_l:][idx_g]], axis=1)
    w2_pack = jnp.concatenate([wl[idx_l], wg[idx_g]], axis=1)
    b2_pack = jnp.concatenate([bl[idx_l], bg[idx_g]], axis=1)[..., None]
    b1_row = b1.reshape(1, hidden)
    return w1_pack, b1_row, w2_pack, b2_pack


# ---------------------------------------------------------------------------
# Fused single-pass kernel (common path)
# ---------------------------------------------------------------------------

def _make_fused_kernel(*, fold, hw, lane, r_l, r_g):
    inv_hw = 1.0 / hw

    def kernel(idl_ref, idg_ref, w1_ref, b1_ref, w2_ref, b2_ref, ol_ref, og_ref):
        """One grid step = `nb` batch items, all channels, full spatial extent.

        idl_ref/ol_ref: (nb, r_l, lane)     idg_ref/og_ref: (nb, r_g, lane)
        w1_ref: (fold, r_l + r_g, hidden)   b1_ref: (1, hidden)
        w2_ref: (fold, r_l + r_g, hidden)   b2_ref: (fold, r_l + r_g, 1)
        """
        if fold > 1:
            lane_ids = jax.lax.broadcasted_iota(jnp.int32, (1, 1, lane), 2)

        def seg_sums(x):
            # Per-(row, lane-slot) sums, accumulated directly in f32 off the
            # activation-dtype tile (no full-tile astype before the reduce).
            if fold == 1:
                return [jnp.sum(x, axis=-1, keepdims=True, dtype=jnp.float32)]
            out = []
            for f in range(fold):
                m = (lane_ids >= f * hw) & (lane_ids < (f + 1) * hw)
                out.append(jnp.sum(jnp.where(m, x, 0), axis=-1, keepdims=True,
                                   dtype=jnp.float32))
            return out

        # ---- 1) Load each tile exactly once; reuse for pool and rescale.
        x_l = idl_ref[...]
        x_g = idg_ref[...]
        sums_l = seg_sums(x_l)                      # fold x (nb, r_l, 1) f32
        sums_g = seg_sums(x_g)                      # fold x (nb, r_g, 1) f32

        # ---- 2) conv1 (1x1) + ReLU on the pooled vector.  Far too small for
        # the MXU, so it runs as broadcast-multiply + sublane reduce on the
        # VPU/XLU.  Weights are (slot, row)-indexed, so summing per-row
        # contributions is exactly the per-channel dot product.  Gate path f32.
        h = b1_ref[...].astype(jnp.float32)                        # (1, hidden)
        for f in range(fold):
            w1l = w1_ref[f, 0:r_l, :].astype(jnp.float32)          # (r_l, hidden)
            w1g = w1_ref[f, r_l:r_l + r_g, :].astype(jnp.float32)  # (r_g, hidden)
            h = h + jnp.sum((sums_l[f] * inv_hw) * w1l[None], axis=1)
            h = h + jnp.sum((sums_g[f] * inv_hw) * w1g[None], axis=1)
        h = jnp.maximum(h, 0.0)                                    # (nb, hidden)
        hb = h[:, None, :]                                         # (nb, 1, hidden)

        # ---- 3+4) conv_a2l / conv_a2g (1x1) + sigmoid -> per-(row, slot)
        # gates, then rescale.  Gates stay f32; the big multiply promotes to
        # f32 and is cast only at the store (v5e-friendly).
        def scale_branch(x, row_off, r_p, out_ref):
            gates = []
            for f in range(fold):
                w2f = w2_ref[f, row_off:row_off + r_p, :].astype(jnp.float32)
                b2f = b2_ref[f, row_off:row_off + r_p, :].astype(jnp.float32)
                gates.append(jax.nn.sigmoid(
                    jnp.sum(hb * w2f[None], axis=-1, keepdims=True) + b2f))
            scale = gates[0]                                       # (nb, r_p, 1)
            for f in range(1, fold):
                scale = jnp.where(lane_ids >= f * hw, gates[f], scale)
            out_ref[...] = (x * scale).astype(out_ref.dtype)

        scale_branch(x_l, 0, r_l, ol_ref)
        scale_branch(x_g, r_l, r_g, og_ref)

    return kernel


# ---------------------------------------------------------------------------
# Two-pass path for feature maps that don't fit a single per-batch tile
# ---------------------------------------------------------------------------

def _make_pool_kernel(hw, hwc):
    need_mask = (hw % hwc) != 0

    def kernel(xl_ref, xg_ref, sl_ref, sg_ref):
        @pl.when(pl.program_id(1) == 0)
        def _init():
            sl_ref[...] = jnp.zeros_like(sl_ref)
            sg_ref[...] = jnp.zeros_like(sg_ref)

        xl = xl_ref[...]
        xg = xg_ref[...]
        if need_mask:  # ragged spatial tail: ignore out-of-bounds lanes
            start = pl.program_id(1) * hwc
            lane_ids = jax.lax.broadcasted_iota(jnp.int32, (1, 1, hwc), 2)
            valid = (start + lane_ids) < hw
            xl = jnp.where(valid, xl, 0)
            xg = jnp.where(valid, xg, 0)
        sl_ref[...] += jnp.sum(xl, axis=-1, keepdims=True, dtype=jnp.float32)
        sg_ref[...] += jnp.sum(xg, axis=-1, keepdims=True, dtype=jnp.float32)

    return kernel


def _scale_kernel(xl_ref, xg_ref, gl_ref, gg_ref, ol_ref, og_ref):
    # Gates stay f32; the multiply promotes and is cast only at the store.
    ol_ref[...] = (xl_ref[...] * gl_ref[...]).astype(ol_ref.dtype)
    og_ref[...] = (xg_ref[...] * gg_ref[...]).astype(og_ref.dtype)


def _ffcse_two_pass(idl3, idg3, params, hw, vmem_limit):
    """Pool (Pallas, spatial grid axis) -> tiny SE MLP (plain JAX) -> scale
    (Pallas, lane-chunked).  Used when a batch item's (read+write) footprint
    exceeds the per-step tile cap; also manufactures extra grid steps for v7x
    when N is small."""
    n, c_l, _ = idl3.shape
    c_g = idg3.shape[1]
    c = c_l + c_g
    itemsize = jnp.dtype(idl3.dtype).itemsize
    tile_cap = max(1, vmem_limit // 8)

    if hw <= 128:
        hwc = hw
    else:
        max_lanes = tile_cap // (2 * c * itemsize)
        hwc = min(hw, max(128, (max_lanes // 128) * 128))
        hwc -= hwc % 128                       # keep chunks lane-aligned
    n_s = pl.cdiv(hw, hwc)

    sum_l, sum_g = pl.pallas_call(
        _make_pool_kernel(hw, hwc),
        out_shape=(jax.ShapeDtypeStruct((n, c_l, 1), jnp.float32),
                   jax.ShapeDtypeStruct((n, c_g, 1), jnp.float32)),
        grid_spec=pltpu.PrefetchScalarGridSpec(
            num_scalar_prefetch=0,
            grid=(n, n_s),
            in_specs=[pl.BlockSpec((1, c_l, hwc), lambda b, s: (b, 0, s)),
                      pl.BlockSpec((1, c_g, hwc), lambda b, s: (b, 0, s))],
            out_specs=[pl.BlockSpec((1, c_l, 1), lambda b, s: (b, 0, 0)),
                       pl.BlockSpec((1, c_g, 1), lambda b, s: (b, 0, 0))]),
        compiler_params=pltpu.CompilerParams(
            dimension_semantics=("parallel", "arbitrary"),
            vmem_limit_bytes=vmem_limit),
    )(idl3, idg3)

    # Tiny SE MLP on the pooled vector: negligible work, left to XLA here.
    w1, b1, wl, bl, wg, bg = params
    f32 = jnp.float32
    hi = jax.lax.Precision.HIGHEST
    pooled = jnp.concatenate([sum_l[..., 0], sum_g[..., 0]], axis=1) * (1.0 / hw)
    h = jnp.maximum(jnp.dot(pooled, w1.astype(f32).T, precision=hi)
                    + b1.astype(f32), 0.0)
    g_l = jax.nn.sigmoid(jnp.dot(h, wl.astype(f32).T, precision=hi)
                         + bl.astype(f32))[..., None]              # (N, C_l, 1)
    g_g = jax.nn.sigmoid(jnp.dot(h, wg.astype(f32).T, precision=hi)
                         + bg.astype(f32))[..., None]              # (N, C_g, 1)

    out_l, out_g = pl.pallas_call(
        _scale_kernel,
        out_shape=(jax.ShapeDtypeStruct(idl3.shape, idl3.dtype),
                   jax.ShapeDtypeStruct(idg3.shape, idg3.dtype)),
        grid_spec=pltpu.PrefetchScalarGridSpec(
            num_scalar_prefetch=0,
            grid=(n, n_s),
            in_specs=[pl.BlockSpec((1, c_l, hwc), lambda b, s: (b, 0, s)),
                      pl.BlockSpec((1, c_g, hwc), lambda b, s: (b, 0, s)),
                      pl.BlockSpec((1, c_l, 1), lambda b, s: (b, 0, 0)),
                      pl.BlockSpec((1, c_g, 1), lambda b, s: (b, 0, 0))],
            out_specs=[pl.BlockSpec((1, c_l, hwc), lambda b, s: (b, 0, s)),
                       pl.BlockSpec((1, c_g, hwc), lambda b, s: (b, 0, s))]),
        compiler_params=pltpu.CompilerParams(
            dimension_semantics=("parallel", "parallel"),
            vmem_limit_bytes=vmem_limit),
    )(idl3, idg3, g_l, g_g)
    return out_l, out_g


# ---------------------------------------------------------------------------
# Public wrapper
# ---------------------------------------------------------------------------

def ffcse_block(id_l, id_g, params, *, donate_inputs=False, force_two_pass=False):
    """FFCSE_block forward.  id_l: (N, C_l, H, W), id_g: (N, C_g, H, W).

    params = (w1, b1, wl, bl, wg, bg) with the 1x1-conv weights as 2-D matrices:
      w1: (hidden, C)    b1: (hidden,)
      wl: (C_l, hidden)  bl: (C_l,)
      wg: (C_g, hidden)  bg: (C_g,)
    Returns (x_l, x_g) with the same shapes / dtypes as the inputs.

    `donate_inputs=True` aliases the activations in/out (SE is naturally
    in-place); the caller must also donate them (jit donate_argnums) for the
    aliasing to be honored without a copy.
    """
    N, C_l, H, W = id_l.shape
    Ng, C_g, Hg, Wg = id_g.shape
    assert (N, H, W) == (Ng, Hg, Wg)
    # TODO(synk): degenerate configs C_l == 0 or C_g == 0 (PyTorch returns the
    # int 0 for the missing branch) are not handled here.
    assert C_l > 0 and C_g > 0
    HW = H * W
    hidden = params[0].shape[0]

    vmem_limit = _vmem_limit_bytes()
    tile_cap = max(1, vmem_limit // 8)      # combined (read + write) per step

    lane, fold, rpc = _choose_layout(C_l, C_g, HW)
    r_l = C_l * HW // lane
    r_g = C_g * HW // lane

    itemsize = jnp.dtype(id_l.dtype).itemsize
    pad_lane = -(-lane // 128) * 128
    pad_rows = (-(-r_l // 8) * 8) + (-(-r_g // 8) * 8)
    per_batch_bytes = 2 * pad_rows * pad_lane * itemsize

    if force_two_pass or per_batch_bytes > tile_cap:
        # Large feature maps (or forced): stream with a spatial grid axis.
        out_l, out_g = _ffcse_two_pass(id_l.reshape(N, C_l, HW),
                                       id_g.reshape(N, C_g, HW),
                                       params, HW, vmem_limit)
        return out_l.reshape(id_l.shape), out_g.reshape(id_g.shape)

    # Free contiguous reshape to the lane-dense (N, R, lane) view.
    idl = id_l.reshape(N, r_l, lane)
    idg = id_g.reshape(N, r_g, lane)
    w1p, b1p, w2p, b2p = _pack_params(params, C_l, C_g, fold, rpc)

    nb = _choose_batch_block(N, per_batch_bytes, tile_cap)
    grid = (pl.cdiv(N, nb),)
    aliases = {0: 0, 1: 1} if donate_inputs else {}

    kernel = _make_fused_kernel(fold=fold, hw=HW, lane=lane, r_l=r_l, r_g=r_g)
    out_l, out_g = pl.pallas_call(
        kernel,
        out_shape=(jax.ShapeDtypeStruct((N, r_l, lane), id_l.dtype),
                   jax.ShapeDtypeStruct((N, r_g, lane), id_g.dtype)),
        grid_spec=pltpu.PrefetchScalarGridSpec(
            num_scalar_prefetch=0,
            grid=grid,
            in_specs=[
                pl.BlockSpec((nb, r_l, lane), lambda n: (n, 0, 0)),
                pl.BlockSpec((nb, r_g, lane), lambda n: (n, 0, 0)),
                # Tiny params: constant index maps -> fetched once and resident.
                pl.BlockSpec(w1p.shape, lambda n: (0, 0, 0)),
                pl.BlockSpec(b1p.shape, lambda n: (0, 0)),
                pl.BlockSpec(w2p.shape, lambda n: (0, 0, 0)),
                pl.BlockSpec(b2p.shape, lambda n: (0, 0, 0)),
            ],
            out_specs=[
                pl.BlockSpec((nb, r_l, lane), lambda n: (n, 0, 0)),
                pl.BlockSpec((nb, r_g, lane), lambda n: (n, 0, 0)),
            ]),
        compiler_params=pltpu.CompilerParams(
            # "parallel" batch-block axis; >= 2 steps whenever N >= 2 so both
            # v7x TensorCores get a shard.
            dimension_semantics=("parallel",),
            vmem_limit_bytes=vmem_limit),
        input_output_aliases=aliases,
    )(idl, idg, w1p, b1p, w2p, b2p)

    return out_l.reshape(id_l.shape), out_g.reshape(id_g.shape)


# ---------------------------------------------------------------------------
# Plain-JAX reference of the PyTorch forward (both branches present)
# ---------------------------------------------------------------------------

def reference(id_l, id_g, params):
    w1, b1, wl, bl, wg, bg = params
    hi = jax.lax.Precision.HIGHEST
    x = jnp.concatenate([id_l, id_g], axis=1)                       # (N, C, H, W)
    pooled = jnp.mean(x, axis=(2, 3))                               # (N, C)
    h = jnp.maximum(jnp.matmul(pooled, w1.T, precision=hi) + b1, 0.0)
    sl = jax.nn.sigmoid(jnp.matmul(h, wl.T, precision=hi) + bl)     # (N, C_l)
    sg = jax.nn.sigmoid(jnp.matmul(h, wg.T, precision=hi) + bg)     # (N, C_g)
    return id_l * sl[:, :, None, None], id_g * sg[:, :, None, None]


if __name__ == "__main__":
    def make_params(key, channels, hidden, in_cl, in_cg):
        ks = jax.random.split(key, 6)
        w1 = 0.1 * jax.random.normal(ks[0], (hidden, channels), jnp.float32)   # conv1
        b1 = 0.1 * jax.random.normal(ks[1], (hidden,), jnp.float32)
        wl = 0.1 * jax.random.normal(ks[2], (in_cl, hidden), jnp.float32)      # conv_a2l
        bl = 0.1 * jax.random.normal(ks[3], (in_cl,), jnp.float32)
        wg = 0.1 * jax.random.normal(ks[4], (in_cg, hidden), jnp.float32)      # conv_a2g
        bg = 0.1 * jax.random.normal(ks[5], (in_cg,), jnp.float32)
        return (w1, b1, wl, bl, wg, bg)

    def check(id_l, id_g, params, rtol, atol, **kw):
        x_l, x_g = ffcse_block(id_l, id_g, params, **kw)
        jax.block_until_ready((x_l, x_g))
        ref_l, ref_g = reference(id_l.astype(jnp.float32),
                                 id_g.astype(jnp.float32), params)
        np.testing.assert_allclose(np.asarray(x_l.astype(jnp.float32)),
                                   np.asarray(ref_l), rtol=rtol, atol=atol)
        np.testing.assert_allclose(np.asarray(x_g.astype(jnp.float32)),
                                   np.asarray(ref_g), rtol=rtol, atol=atol)

    # Module config: channels=64, ratio_g=0.5, r=16 -> in_cl=32, in_cg=32, hidden=4.
    channels, ratio_g, r = 64, 0.5, 16
    in_cg = int(channels * ratio_g)
    in_cl = channels - in_cg
    hidden = channels // r

    key = jax.random.PRNGKey(0)
    params = make_params(jax.random.fold_in(key, 1), channels, hidden, in_cl, in_cg)
    k1, k2, k3, k4 = jax.random.split(key, 4)

    # 1) 8x8 maps (HW = 64 < 128): lane-folded layout, 2 channels per 128-lane row.
    id_l = jax.random.normal(k1, (2, in_cl, 8, 8), jnp.float32)
    id_g = jax.random.normal(k2, (2, in_cg, 8, 8), jnp.float32)
    check(id_l, id_g, params, 1e-5, 1e-5)

    # 2) HW = 128: row-aligned lane-dense layout.
    id_l2 = jax.random.normal(k3, (2, in_cl, 16, 8), jnp.float32)
    id_g2 = jax.random.normal(k4, (2, in_cg, 16, 8), jnp.float32)
    check(id_l2, id_g2, params, 1e-5, 1e-5)

    # 3) Unaligned 7x7 maps, N=3: fallback layout + partial last batch block.
    id_l3 = jax.random.normal(k3, (3, in_cl, 7, 7), jnp.float32)
    id_g3 = jax.random.normal(k4, (3, in_cg, 7, 7), jnp.float32)
    check(id_l3, id_g3, params, 1e-5, 1e-5)

    # 4) Forced two-pass (large-feature-map) path on the small inputs.
    check(id_l, id_g, params, 1e-5, 1e-5, force_two_pass=True)

    # 5) bf16 activations: gate math and multiply in f32, cast only at the store.
    check(id_l.astype(jnp.bfloat16), id_g.astype(jnp.bfloat16), params, 1e-2, 1e-2)

    print("KERNEL_OK")
</pallas_src>

<mosaic_0001>
module attributes {stable_mosaic.version = 11 : i64} {
  func.func @kernel(%arg0: i32, %arg1: memref<1x16x128xf32, #tpu.memory_space<vmem>>, %arg2: memref<1x16x128xf32, #tpu.memory_space<vmem>>, %arg3: memref<2x32x4xf32, #tpu.memory_space<vmem>>, %arg4: memref<1x4xf32, #tpu.memory_space<vmem>>, %arg5: memref<2x32x4xf32, #tpu.memory_space<vmem>>, %arg6: memref<2x32x1xf32, #tpu.memory_space<vmem>>, %arg7: memref<1x16x128xf32, #tpu.memory_space<vmem>>, %arg8: memref<1x16x128xf32, #tpu.memory_space<vmem>>) attributes {dimension_semantics = [#tpu.dimension_semantics<parallel>], iteration_bounds = array<i64: 2>, scalar_prefetch = 0 : i64, scratch_operands = 0 : i64, tpu.core_type = #tpu.core_type<tc>, window_params = [{transform_indices = @transform_0, window_bounds = array<i64: 1, 16, 128>}, {transform_indices = @transform_1, window_bounds = array<i64: 1, 16, 128>}, {pipeline_mode = #tpu.pipeline_mode<synchronous>, transform_indices = @transform_2, window_bounds = array<i64: 2, 32, 4>}, {pipeline_mode = #tpu.pipeline_mode<synchronous>, transform_indices = @transform_3, window_bounds = array<i64: 1, 4>}, {pipeline_mode = #tpu.pipeline_mode<synchronous>, transform_indices = @transform_4, window_bounds = array<i64: 2, 32, 4>}, {pipeline_mode = #tpu.pipeline_mode<synchronous>, transform_indices = @transform_5, window_bounds = array<i64: 2, 32, 1>}, {transform_indices = @transform_6, window_bounds = array<i64: 1, 16, 128>}, {transform_indices = @transform_7, window_bounds = array<i64: 1, 16, 128>}]} {
    %0 = tpu.iota {dimensions = array<i32: 2>} : vector<1x1x128xi32>
    %c0 = arith.constant 0 : index
    %c0_0 = arith.constant 0 : index
    %c0_1 = arith.constant 0 : index
    %1 = vector.load %arg1[%c0, %c0_0, %c0_1] : memref<1x16x128xf32, #tpu.memory_space<vmem>>, vector<1x16x128xf32>
    %c0_2 = arith.constant 0 : index
    %c0_3 = arith.constant 0 : index
    %c0_4 = arith.constant 0 : index
    %2 = vector.load %arg2[%c0_2, %c0_3, %c0_4] : memref<1x16x128xf32, #tpu.memory_space<vmem>>, vector<1x16x128xf32>
    %c0_i32 = arith.constant 0 : i32
    %3 = vector.broadcast %c0_i32 : i32 to vector<1x1x128xi32>
    %4 = arith.cmpi sge, %0, %3 : vector<1x1x128xi32>
    %c64_i32 = arith.constant 64 : i32
    %5 = vector.broadcast %c64_i32 : i32 to vector<1x1x128xi32>
    %6 = arith.cmpi slt, %0, %5 : vector<1x1x128xi32>
    %7 = arith.andi %4, %6 : vector<1x1x128xi1>
    %c0_i32_5 = arith.constant 0 : i32
    %8 = arith.sitofp %c0_i32_5 : i32 to f32
    %9 = vector.shape_cast %7 : vector<1x1x128xi1> to vector<1x1x128xi1>
    %10 = vector.broadcast %9 : vector<1x1x128xi1> to vector<1x16x128xi1>
    %11 = vector.broadcast %8 : f32 to vector<1x16x128xf32>
    %12 = arith.select %10, %1, %11 : vector<1x16x128xi1>, vector<1x16x128xf32>
    %cst = arith.constant dense<0.000000e+00> : vector<1x16xf32>
    %13 = vector.multi_reduction <add>, %12, %cst [2] : vector<1x16x128xf32> to vector<1x16xf32>
    %14 = vector.shape_cast %13 : vector<1x16xf32> to vector<1x16x1xf32>
    %c64_i32_6 = arith.constant 64 : i32
    %15 = vector.broadcast %c64_i32_6 : i32 to vector<1x1x128xi32>
    %16 = arith.cmpi sge, %0, %15 : vector<1x1x128xi32>
    %c128_i32 = arith.constant 128 : i32
    %17 = vector.broadcast %c128_i32 : i32 to vector<1x1x128xi32>
    %18 = arith.cmpi slt, %0, %17 : vector<1x1x128xi32>
    %19 = arith.andi %16, %18 : vector<1x1x128xi1>
    %c0_i32_7 = arith.constant 0 : i32
    %20 = arith.sitofp %c0_i32_7 : i32 to f32
    %21 = vector.shape_cast %19 : vector<1x1x128xi1> to vector<1x1x128xi1>
    %22 = vector.broadcast %21 : vector<1x1x128xi1> to vector<1x16x128xi1>
    %23 = vector.broadcast %20 : f32 to vector<1x16x128xf32>
    %24 = arith.select %22, %1, %23 : vector<1x16x128xi1>, vector<1x16x128xf32>
    %cst_8 = arith.constant dense<0.000000e+00> : vector<1x16xf32>
    %25 = vector.multi_reduction <add>, %24, %cst_8 [2] : vector<1x16x128xf32> to vector<1x16xf32>
    %26 = vector.shape_cast %25 : vector<1x16xf32> to vector<1x16x1xf32>
    %c0_i32_9 = arith.constant 0 : i32
    %27 = vector.broadcast %c0_i32_9 : i32 to vector<1x1x128xi32>
    %28 = arith.cmpi sge, %0, %27 : vector<1x1x128xi32>
    %c64_i32_10 = arith.constant 64 : i32
    %29 = vector.broadcast %c64_i32_10 : i32 to vector<1x1x128xi32>
    %30 = arith.cmpi slt, %0, %29 : vector<1x1x128xi32>
    %31 = arith.andi %28, %30 : vector<1x1x128xi1>
    %c0_i32_11 = arith.constant 0 : i32
    %32 = arith.sitofp %c0_i32_11 : i32 to f32
    %33 = vector.shape_cast %31 : vector<1x1x128xi1> to vector<1x1x128xi1>
    %34 = vector.broadcast %33 : vector<1x1x128xi1> to vector<1x16x128xi1>
    %35 = vector.broadcast %32 : f32 to vector<1x16x128xf32>
    %36 = arith.select %34, %2, %35 : vector<1x16x128xi1>, vector<1x16x128xf32>
    %cst_12 = arith.constant dense<0.000000e+00> : vector<1x16xf32>
    %37 = vector.multi_reduction <add>, %36, %cst_12 [2] : vector<1x16x128xf32> to vector<1x16xf32>
    %38 = vector.shape_cast %37 : vector<1x16xf32> to vector<1x16x1xf32>
    %c64_i32_13 = arith.constant 64 : i32
    %39 = vector.broadcast %c64_i32_13 : i32 to vector<1x1x128xi32>
    %40 = arith.cmpi sge, %0, %39 : vector<1x1x128xi32>
    %c128_i32_14 = arith.constant 128 : i32
    %41 = vector.broadcast %c128_i32_14 : i32 to vector<1x1x128xi32>
    %42 = arith.cmpi slt, %0, %41 : vector<1x1x128xi32>
    %43 = arith.andi %40, %42 : vector<1x1x128xi1>
    %c0_i32_15 = arith.constant 0 : i32
    %44 = arith.sitofp %c0_i32_15 : i32 to f32
    %45 = vector.shape_cast %43 : vector<1x1x128xi1> to vector<1x1x128xi1>
    %46 = vector.broadcast %45 : vector<1x1x128xi1> to vector<1x16x128xi1>
    %47 = vector.broadcast %44 : f32 to vector<1x16x128xf32>
    %48 = arith.select %46, %2, %47 : vector<1x16x128xi1>, vector<1x16x128xf32>
    %cst_16 = arith.constant dense<0.000000e+00> : vector<1x16xf32>
    %49 = vector.multi_reduction <add>, %48, %cst_16 [2] : vector<1x16x128xf32> to vector<1x16xf32>
    %50 = vector.shape_cast %49 : vector<1x16xf32> to vector<1x16x1xf32>
    %c0_17 = arith.constant 0 : index
    %c0_18 = arith.constant 0 : index
    %51 = vector.load %arg4[%c0_17, %c0_18] : memref<1x4xf32, #tpu.memory_space<vmem>>, vector<1x4xf32>
    %c0_19 = arith.constant 0 : index
    %c0_20 = arith.constant 0 : index
    %c0_21 = arith.constant 0 : index
    %52 = vector.load %arg3[%c0_19, %c0_20, %c0_21] : memref<2x32x4xf32, #tpu.memory_space<vmem>>, vector<1x16x4xf32>
    %53 = vector.shape_cast %52 : vector<1x16x4xf32> to vector<16x4xf32>
    %c0_22 = arith.constant 0 : index
    %c16 = arith.constant 16 : index
    %c0_23 = arith.constant 0 : index
    %54 = vector.load %arg3[%c0_22, %c16, %c0_23] : memref<2x32x4xf32, #tpu.memory_space<vmem>>, vector<1x16x4xf32>
    %55 = vector.shape_cast %54 : vector<1x16x4xf32> to vector<16x4xf32>
    %cst_24 = arith.constant 1.562500e-02 : f32
    %56 = vector.broadcast %cst_24 : f32 to vector<1x16x1xf32>
    %57 = arith.mulf %14, %56 : vector<1x16x1xf32>
    %58 = vector.shape_cast %53 : vector<16x4xf32> to vector<1x16x4xf32>
    %59 = vector.broadcast %57 : vector<1x16x1xf32> to vector<1x16x4xf32>
    %60 = arith.mulf %59, %58 : vector<1x16x4xf32>
    %cst_25 = arith.constant dense<0.000000e+00> : vector<1x4xf32>
    %61 = vector.multi_reduction <add>, %60, %cst_25 [1] : vector<1x16x4xf32> to vector<1x4xf32>
    %62 = arith.addf %51, %61 : vector<1x4xf32>
    %cst_26 = arith.constant 1.562500e-02 : f32
    %63 = vector.broadcast %cst_26 : f32 to vector<1x16x1xf32>
    %64 = arith.mulf %38, %63 : vector<1x16x1xf32>
    %65 = vector.shape_cast %55 : vector<16x4xf32> to vector<1x16x4xf32>
    %66 = vector.broadcast %64 : vector<1x16x1xf32> to vector<1x16x4xf32>
    %67 = arith.mulf %66, %65 : vector<1x16x4xf32>
    %cst_27 = arith.constant dense<0.000000e+00> : vector<1x4xf32>
    %68 = vector.multi_reduction <add>, %67, %cst_27 [1] : vector<1x16x4xf32> to vector<1x4xf32>
    %69 = arith.addf %62, %68 : vector<1x4xf32>
    %c1 = arith.constant 1 : index
    %c0_28 = arith.constant 0 : index
    %c0_29 = arith.constant 0 : index
    %70 = vector.load %arg3[%c1, %c0_28, %c0_29] : memref<2x32x4xf32, #tpu.memory_space<vmem>>, vector<1x16x4xf32>
    %71 = vector.shape_cast %70 : vector<1x16x4xf32> to vector<16x4xf32>
    %c1_30 = arith.constant 1 : index
    %c16_31 = arith.constant 16 : index
    %c0_32 = arith.constant 0 : index
    %72 = vector.load %arg3[%c1_30, %c16_31, %c0_32] : memref<2x32x4xf32, #tpu.memory_space<vmem>>, vector<1x16x4xf32>
    %73 = vector.shape_cast %72 : vector<1x16x4xf32> to vector<16x4xf32>
    %cst_33 = arith.constant 1.562500e-02 : f32
    %74 = vector.broadcast %cst_33 : f32 to vector<1x16x1xf32>
    %75 = arith.mulf %26, %74 : vector<1x16x1xf32>
    %76 = vector.shape_cast %71 : vector<16x4xf32> to vector<1x16x4xf32>
    %77 = vector.broadcast %75 : vector<1x16x1xf32> to vector<1x16x4xf32>
    %78 = arith.mulf %77, %76 : vector<1x16x4xf32>
    %cst_34 = arith.constant dense<0.000000e+00> : vector<1x4xf32>
    %79 = vector.multi_reduction <add>, %78, %cst_34 [1] : vector<1x16x4xf32> to vector<1x4xf32>
    %80 = arith.addf %69, %79 : vector<1x4xf32>
    %cst_35 = arith.constant 1.562500e-02 : f32
    %81 = vector.broadcast %cst_35 : f32 to vector<1x16x1xf32>
    %82 = arith.mulf %50, %81 : vector<1x16x1xf32>
    %83 = vector.shape_cast %73 : vector<16x4xf32> to vector<1x16x4xf32>
    %84 = vector.broadcast %82 : vector<1x16x1xf32> to vector<1x16x4xf32>
    %85 = arith.mulf %84, %83 : vector<1x16x4xf32>
    %cst_36 = arith.constant dense<0.000000e+00> : vector<1x4xf32>
    %86 = vector.multi_reduction <add>, %85, %cst_36 [1] : vector<1x16x4xf32> to vector<1x4xf32>
    %87 = arith.addf %80, %86 : vector<1x4xf32>
    %cst_37 = arith.constant 0.000000e+00 : f32
    %88 = vector.broadcast %cst_37 : f32 to vector<1x4xf32>
    %89 = arith.maximumf %87, %88 : vector<1x4xf32>
    %90 = vector.shape_cast %89 : vector<1x4xf32> to vector<1x1x4xf32>
    %c0_38 = arith.constant 0 : index
    %c0_39 = arith.constant 0 : index
    %c0_40 = arith.constant 0 : index
    %91 = vector.load %arg5[%c0_38, %c0_39, %c0_40] : memref<2x32x4xf32, #tpu.memory_space<vmem>>, vector<1x16x4xf32>
    %92 = vector.shape_cast %91 : vector<1x16x4xf32> to vector<16x4xf32>
    %c0_41 = arith.constant 0 : index
    %c0_42 = arith.constant 0 : index
    %c0_43 = arith.constant 0 : index
    %93 = vector.load %arg6[%c0_41, %c0_42, %c0_43] : memref<2x32x1xf32, #tpu.memory_space<vmem>>, vector<1x16x1xf32>
    %94 = vector.shape_cast %93 : vector<1x16x1xf32> to vector<16x1xf32>
    %95 = vector.shape_cast %92 : vector<16x4xf32> to vector<1x16x4xf32>
    %96 = vector.broadcast %90 : vector<1x1x4xf32> to vector<1x16x4xf32>
    %97 = arith.mulf %96, %95 : vector<1x16x4xf32>
    %cst_44 = arith.constant dense<0.000000e+00> : vector<1x16xf32>
    %98 = vector.multi_reduction <add>, %97, %cst_44 [2] : vector<1x16x4xf32> to vector<1x16xf32>
    %99 = vector.shape_cast %98 : vector<1x16xf32> to vector<1x16x1xf32>
    %100 = vector.shape_cast %94 : vector<16x1xf32> to vector<1x16x1xf32>
    %101 = arith.addf %99, %100 : vector<1x16x1xf32>
    %102 = arith.negf %101 : vector<1x16x1xf32>
    %103 = math.exp %102 : vector<1x16x1xf32>
    %cst_45 = arith.constant 1.000000e+00 : f32
    %104 = vector.broadcast %cst_45 : f32 to vector<1x16x1xf32>
    %105 = arith.addf %104, %103 : vector<1x16x1xf32>
    %106 = arith.divf %104, %105 : vector<1x16x1xf32>
    %c1_46 = arith.constant 1 : index
    %c0_47 = arith.constant 0 : index
    %c0_48 = arith.constant 0 : index
    %107 = vector.load %arg5[%c1_46, %c0_47, %c0_48] : memref<2x32x4xf32, #tpu.memory_space<vmem>>, vector<1x16x4xf32>
    %108 = vector.shape_cast %107 : vector<1x16x4xf32> to vector<16x4xf32>
    %c1_49 = arith.constant 1 : index
    %c0_50 = arith.constant 0 : index
    %c0_51 = arith.constant 0 : index
    %109 = vector.load %arg6[%c1_49, %c0_50, %c0_51] : memref<2x32x1xf32, #tpu.memory_space<vmem>>, vector<1x16x1xf32>
    %110 = vector.shape_cast %109 : vector<1x16x1xf32> to vector<16x1xf32>
    %111 = vector.shape_cast %108 : vector<16x4xf32> to vector<1x16x4xf32>
    %112 = vector.broadcast %90 : vector<1x1x4xf32> to vector<1x16x4xf32>
    %113 = arith.mulf %112, %111 : vector<1x16x4xf32>
    %cst_52 = arith.constant dense<0.000000e+00> : vector<1x16xf32>
    %114 = vector.multi_reduction <add>, %113, %cst_52 [2] : vector<1x16x4xf32> to vector<1x16xf32>
    %115 = vector.shape_cast %114 : vector<1x16xf32> to vector<1x16x1xf32>
    %116 = vector.shape_cast %110 : vector<16x1xf32> to vector<1x16x1xf32>
    %117 = arith.addf %115, %116 : vector<1x16x1xf32>
    %118 = arith.negf %117 : vector<1x16x1xf32>
    %119 = math.exp %118 : vector<1x16x1xf32>
    %cst_53 = arith.constant 1.000000e+00 : f32
    %120 = vector.broadcast %cst_53 : f32 to vector<1x16x1xf32>
    %121 = arith.addf %120, %119 : vector<1x16x1xf32>
    %122 = arith.divf %120, %121 : vector<1x16x1xf32>
    %c64_i32_54 = arith.constant 64 : i32
    %123 = vector.broadcast %c64_i32_54 : i32 to vector<1x1x128xi32>
    %124 = arith.cmpi sge, %0, %123 : vector<1x1x128xi32>
    %125 = vector.shape_cast %124 : vector<1x1x128xi1> to vector<1x1x128xi1>
    %126 = vector.broadcast %125 : vector<1x1x128xi1> to vector<1x16x128xi1>
    %127 = vector.shape_cast %122 : vector<1x16x1xf32> to vector<1x16x1xf32>
    %128 = vector.broadcast %127 : vector<1x16x1xf32> to vector<1x16x128xf32>
    %129 = vector.shape_cast %106 : vector<1x16x1xf32> to vector<1x16x1xf32>
    %130 = vector.broadcast %129 : vector<1x16x1xf32> to vector<1x16x128xf32>
    %131 = arith.select %126, %128, %130 : vector<1x16x128xi1>, vector<1x16x128xf32>
    %132 = arith.mulf %1, %131 : vector<1x16x128xf32>
    %c0_55 = arith.constant 0 : index
    %c0_56 = arith.constant 0 : index
    %c0_57 = arith.constant 0 : index
    %133 = vector.load %arg7[%c0_55, %c0_56, %c0_57] : memref<1x16x128xf32, #tpu.memory_space<vmem>>, vector<1x16x128xf32>
    tpu.vector_store %arg7[%c0_55, %c0_56, %c0_57], %132 {strides = array<i32>} : memref<1x16x128xf32, #tpu.memory_space<vmem>>, vector<1x16x128xf32>,
    %c0_58 = arith.constant 0 : index
    %c16_59 = arith.constant 16 : index
    %c0_60 = arith.constant 0 : index
    %134 = vector.load %arg5[%c0_58, %c16_59, %c0_60] : memref<2x32x4xf32, #tpu.memory_space<vmem>>, vector<1x16x4xf32>
    %135 = vector.shape_cast %134 : vector<1x16x4xf32> to vector<16x4xf32>
    %c0_61 = arith.constant 0 : index
    %c16_62 = arith.constant 16 : index
    %c0_63 = arith.constant 0 : index
    %136 = vector.load %arg6[%c0_61, %c16_62, %c0_63] : memref<2x32x1xf32, #tpu.memory_space<vmem>>, vector<1x16x1xf32>
    %137 = vector.shape_cast %136 : vector<1x16x1xf32> to vector<16x1xf32>
    %138 = vector.shape_cast %135 : vector<16x4xf32> to vector<1x16x4xf32>
    %139 = vector.broadcast %90 : vector<1x1x4xf32> to vector<1x16x4xf32>
    %140 = arith.mulf %139, %138 : vector<1x16x4xf32>
    %cst_64 = arith.constant dense<0.000000e+00> : vector<1x16xf32>
    %141 = vector.multi_reduction <add>, %140, %cst_64 [2] : vector<1x16x4xf32> to vector<1x16xf32>
    %142 = vector.shape_cast %141 : vector<1x16xf32> to vector<1x16x1xf32>
    %143 = vector.shape_cast %137 : vector<16x1xf32> to vector<1x16x1xf32>
    %144 = arith.addf %142, %143 : vector<1x16x1xf32>
    %145 = arith.negf %144 : vector<1x16x1xf32>
    %146 = math.exp %145 : vector<1x16x1xf32>
    %cst_65 = arith.constant 1.000000e+00 : f32
    %147 = vector.broadcast %cst_65 : f32 to vector<1x16x1xf32>
    %148 = arith.addf %147, %146 : vector<1x16x1xf32>
    %149 = arith.divf %147, %148 : vector<1x16x1xf32>
    %c1_66 = arith.constant 1 : index
    %c16_67 = arith.constant 16 : index
    %c0_68 = arith.constant 0 : index
    %150 = vector.load %arg5[%c1_66, %c16_67, %c0_68] : memref<2x32x4xf32, #tpu.memory_space<vmem>>, vector<1x16x4xf32>
    %151 = vector.shape_cast %150 : vector<1x16x4xf32> to vector<16x4xf32>
    %c1_69 = arith.constant 1 : index
    %c16_70 = arith.constant 16 : index
    %c0_71 = arith.constant 0 : index
    %152 = vector.load %arg6[%c1_69, %c16_70, %c0_71] : memref<2x32x1xf32, #tpu.memory_space<vmem>>, vector<1x16x1xf32>
    %153 = vector.shape_cast %152 : vector<1x16x1xf32> to vector<16x1xf32>
    %154 = vector.shape_cast %151 : vector<16x4xf32> to vector<1x16x4xf32>
    %155 = vector.broadcast %90 : vector<1x1x4xf32> to vector<1x16x4xf32>
    %156 = arith.mulf %155, %154 : vector<1x16x4xf32>
    %cst_72 = arith.constant dense<0.000000e+00> : vector<1x16xf32>
    %157 = vector.multi_reduction <add>, %156, %cst_72 [2] : vector<1x16x4xf32> to vector<1x16xf32>
    %158 = vector.shape_cast %157 : vector<1x16xf32> to vector<1x16x1xf32>
    %159 = vector.shape_cast %153 : vector<16x1xf32> to vector<1x16x1xf32>
    %160 = arith.addf %158, %159 : vector<1x16x1xf32>
    %161 = arith.negf %160 : vector<1x16x1xf32>
    %162 = math.exp %161 : vector<1x16x1xf32>
    %cst_73 = arith.constant 1.000000e+00 : f32
    %163 = vector.broadcast %cst_73 : f32 to vector<1x16x1xf32>
    %164 = arith.addf %163, %162 : vector<1x16x1xf32>
    %165 = arith.divf %163, %164 : vector<1x16x1xf32>
    %c64_i32_74 = arith.constant 64 : i32
    %166 = vector.broadcast %c64_i32_74 : i32 to vector<1x1x128xi32>
    %167 = arith.cmpi sge, %0, %166 : vector<1x1x128xi32>
    %168 = vector.shape_cast %167 : vector<1x1x128xi1> to vector<1x1x128xi1>
    %169 = vector.broadcast %168 : vector<1x1x128xi1> to vector<1x16x128xi1>
    %170 = vector.shape_cast %165 : vector<1x16x1xf32> to vector<1x16x1xf32>
    %171 = vector.broadcast %170 : vector<1x16x1xf32> to vector<1x16x128xf32>
    %172 = vector.shape_cast %149 : vector<1x16x1xf32> to vector<1x16x1xf32>
    %173 = vector.broadcast %172 : vector<1x16x1xf32> to vector<1x16x128xf32>
    %174 = arith.select %169, %171, %173 : vector<1x16x128xi1>, vector<1x16x128xf32>
    %175 = arith.mulf %2, %174 : vector<1x16x128xf32>
    %c0_75 = arith.constant 0 : index
    %c0_76 = arith.constant 0 : index
    %c0_77 = arith.constant 0 : index
    %176 = vector.load %arg8[%c0_75, %c0_76, %c0_77] : memref<1x16x128xf32, #tpu.memory_space<vmem>>, vector<1x16x128xf32>
    tpu.vector_store %arg8[%c0_75, %c0_76, %c0_77], %175 {strides = array<i32>} : memref<1x16x128xf32, #tpu.memory_space<vmem>>, vector<1x16x128xf32>,
    return
  }
  func.func @transform_0(%arg0: i32) -> (i32, i32, i32) {
    %c0_i32 = arith.constant 0 : i32
    %c0_i32_0 = arith.constant 0 : i32
    %c0_i32_1 = arith.constant 0 : i32
    return %arg0, %c0_i32, %c0_i32_0 : i32, i32, i32
  }
  func.func @transform_1(%arg0: i32) -> (i32, i32, i32) {
    %c0_i32 = arith.constant 0 : i32
    %c0_i32_0 = arith.constant 0 : i32
    %c0_i32_1 = arith.constant 0 : i32
    return %arg0, %c0_i32, %c0_i32_0 : i32, i32, i32
  }
  func.func @transform_2(%arg0: i32) -> (i32, i32, i32) {
    %c0_i32 = arith.constant 0 : i32
    %c0_i32_0 = arith.constant 0 : i32
    %c0_i32_1 = arith.constant 0 : i32
    %c0_i32_2 = arith.constant 0 : i32
    return %c0_i32, %c0_i32_0, %c0_i32_1 : i32, i32, i32
  }
  func.func @transform_3(%arg0: i32) -> (i32, i32) {
    %c0_i32 = arith.constant 0 : i32
    %c0_i32_0 = arith.constant 0 : i32
    %c0_i32_1 = arith.constant 0 : i32
    return %c0_i32, %c0_i32_0 : i32, i32
  }
  func.func @transform_4(%arg0: i32) -> (i32, i32, i32) {
    %c0_i32 = arith.constant 0 : i32
    %c0_i32_0 = arith.constant 0 : i32
    %c0_i32_1 = arith.constant 0 : i32
    %c0_i32_2 = arith.constant 0 : i32
    return %c0_i32, %c0_i32_0, %c0_i32_1 : i32, i32, i32
  }
  func.func @transform_5(%arg0: i32) -> (i32, i32, i32) {
    %c0_i32 = arith.constant 0 : i32
    %c0_i32_0 = arith.constant 0 : i32
    %c0_i32_1 = arith.constant 0 : i32
    %c0_i32_2 = arith.constant 0 : i32
    return %c0_i32, %c0_i32_0, %c0_i32_1 : i32, i32, i32
  }
  func.func @transform_6(%arg0: i32) -> (i32, i32, i32) {
    %c0_i32 = arith.constant 0 : i32
    %c0_i32_0 = arith.constant 0 : i32
    %c0_i32_1 = arith.constant 0 : i32
    return %arg0, %c0_i32, %c0_i32_0 : i32, i32, i32
  }
  func.func @transform_7(%arg0: i32) -> (i32, i32, i32) {
    %c0_i32 = arith.constant 0 : i32
    %c0_i32_0 = arith.constant 0 : i32
    %c0_i32_1 = arith.constant 0 : i32
    return %arg0, %c0_i32, %c0_i32_0 : i32, i32, i32
  }
}

</mosaic_0001>

<bundles_post_ra>
// kernel: tpu_custom_call.1
= control target key start
LH: loop header
LB: loop body
LE: loop exit
PB: predicated region body
PF: predicated region fallthrough
CT: control target
= control target key end

     0   :  { %13 = vsyncpa [#allocation3], 0  ;;  %s1266_s0 = inlined_call_operand.vmem [shape: f32[2,16,128], index: 0, kind: input, shape index: {}]   ;;  %s1267_s1 = inlined_call_operand.vmem [shape: f32[2,16,128], index: 1, kind: input, shape index: {}]   ;;  %s1268_s2 = inlined_call_operand.vmem [shape: f32[2,32,4], index: 2, kind: input, shape index: {}]   ;;  %s1269_s3 = inlined_call_operand.vmem [shape: f32[1,4], index: 3, kind: input, shape index: {}]   ;;  %s1270_s4 = inlined_call_operand.vmem [shape: f32[2,32,4], index: 4, kind: input, shape index: {}]   ;;  %s1271_s5 = inlined_call_operand.vmem [shape: f32[2,32,1], index: 5, kind: input, shape index: {}]   ;;  %s1272_s6 = inlined_call_operand.hbm [shape: f32[2,16,128], index: 6, kind: output, shape index: {0}]   ;;  %s1273_s7 = inlined_call_operand.hbm [shape: f32[2,16,128], index: 7, kind: output, shape index: {1}]  }
   0x1   :  { %15 = vsyncpa [#allocation3 + $0x1], 0 }
   0x2   :  { %16 = vsyncpa [#allocation5], 0 }
   0x3   :  { %18 = vsyncpa [#allocation5 + $0x1], 0  ;;  %s983_s24 = smov 0   ;;  %s985_s25 = smov 0  }
   0x4   :  { %s987_s26 = smov 0   ;;  %s989_s27 = smov 0  }
   0x5 LB: > { %s1004_s28 = sadd.s32 4294967295, %s936_s27   ;;  %s723_s29 = sadd.s32 4294967294, %s936_s27   ;;  %s936_s27 = sphi %s989_s27, %s1281_s27   ;;  %s932_s26 = sphi %s987_s26, %s1280_s26   ;;  %s928_s25 = sphi %s985_s25, %s1279_s25   ;;  %s924_s24 = sphi %s983_s24, %s1278_s24  }
   0x6   : > { %s1008_s30 = sadd.s32 1, %s936_s27   ;;  %s167_s8 = sadd.s32 1, %s932_s26 }
   0x7   : > { %s164_s9 = ssub.s32 %s936_s27, %s1008_s30  ;;  %p177_p0 = scmp.ne.s32.totalorder %s932_s26, %s928_s25 }
   0x8   : > { %p165_p1 = scmp.eq.s32.totalorder %s164_s9, 0  ;;  %p178_p2 = scmp.eq.s32.totalorder %s1004_s28, 1 }
   0x9   : > { %p183_p3 = scmp.ne.s32.totalorder %s928_s25, %s924_s24  ;;  %p184_p4 = scmp.eq.s32.totalorder %s723_s29, 1 }
   0xa   : > { %s1019_s10 = scalar_select %p165_p1, %s932_s26, %s167_s8  }
   0xb   : > { %p1021_p5 = por %p178_p2, %p177_p0  ;;  %p1025_p6 = por %p184_p4, %p183_p3 }
   0xc   : > { %p726_p7 = scmp.ge.s32.totalorder %s936_s27, 1  ;;  %p256_p8 = scmp.lt.s32.totalorder %s936_s27, 3 }
   0xe   : > { %p257_p9 = pnand %p726_p7, %p256_p8 }
   0xf   : > { %p298_p10 = scmp.lt.s32.totalorder (!%p257_p9), %s1004_s28, 1  ;;  %s1161_s15 = sand.u32 (!%p257_p9), 1, %s928_s25  }
  0x10   : > { %260 = sbr.rel (%p257_p9) target bundleno = 555 (0x22b), region = 44  ;;  %s727_s16 = sshll.u32 (!%p257_p9), %s1161_s15, 4 }
  0x11   : > { %s1274_s19 = sshll.u32 (!%p257_p9), %s1004_s28, 8  ;;  %s583_s23 = scalar_lea.sflag (!%p257_p9), [#allocation3], %s1161_s15 }
  0x12   : > { %s1179_s22 = scalar_lea.hbm (!%p257_p9), %s1272_s6, %s1274_s19  ;;  %s939_s8 = smov (!%p257_p9), [#allocation2]  }
  0x13   : > { %s850_s9 = sshll.u32 (!%p257_p9), %s939_s8, 4  ;;  %s851_s9 = int_to_ptr.vmem [resolvable:$false] %s850_s9 }
  0x15   : > { %v308_v0 = vlaneseq  ;;  %s299_s13 = scalar_select %p298_p10, %s1004_s28, 1  ;;  %v351_v16 = vld [vmem:[%s1268_s2 + $0x10] sm:$0xff]  ;;  %v349_v18 = vld [vmem:[%s1268_s2] sm:$0xff]  ;;  %v352_v22 = vld [vmem:[%s1268_s2 + $0x18] sm:$0xff]  ;;  %vm357_vm2 = vcmask 31744  }
  0x16   : > { %v350_v24 = vld [vmem:[%s1268_s2 + $0x8] sm:$0xff]  ;;  %v733_v34 = vld [vmem:[%s1268_s2 + $0x20] sm:$0xff]  ;;  %v736_v46 = vld [vmem:[%s1268_s2 + $0x38] sm:$0xff] }
  0x17   : > { %v1034_v1 = vand.u32 127, %v308_v0  ;;  %s761_s14 = sshll.u32 %s299_s13, 4  ;;  %v734_v32 = vld [vmem:[%s1268_s2 + $0x28] sm:$0xff]  ;;  %v735_v48 = vld [vmem:[%s1268_s2 + $0x30] sm:$0xff]  ;;  %s852_s13 = scalar_lea.vmem %s851_s9, 512 }
  0x18   : > { %s307_s17 = scalar_lea.vmem %s1267_s1, %s761_s14  ;;  %s302_s20 = scalar_lea.vmem %s1266_s0, %s761_s14 }
  0x19   : > { %vm315_vm0 = vcmp.lt.s32.totalorder %v1034_v1, 64  ;;  %v1043_v2 = vld [vmem:[%s307_s17] sm:$0xff]  ;;  %v1047_v4 = vld [vmem:[%s307_s17 + $0x8] sm:$0xff]  ;;  %vm325_vm1 = vcmp.ge.s32.totalorder %v1034_v1, 64  ;;  %s290_s17 = scalar_lea.vmem [#allocation2], %s727_s16 }
  0x1a   : > { %v1045_v3 = vld [vmem:[%s302_s20] sm:$0xff]  ;;  %v336_v5 = vsel %vm315_vm0, %v1043_v2, 0.0  ;;  %v1051_v7 = vld [vmem:[%s302_s20 + $0x8] sm:$0xff]  ;;  %v337_v8 = vsel %vm315_vm0, %v1047_v4, 0.0  ;;  %v343_v12 = vsel %vm325_vm1, %v1047_v4, 0.0  ;;  %v342_v13 = vsel %vm325_vm1, %v1043_v2, 0.0 }
  0x1b   : > { %v319_v6 = vsel %vm315_vm0, %v1045_v3, 0.0  ;;  %338 = vadd.xlane.f32.xlu1 %v336_v5  ;;  %v320_v9 = vsel %vm315_vm0, %v1051_v7, 0.0  ;;  %v331_v10 = vsel %vm325_vm1, %v1051_v7, 0.0  ;;  %v330_v11 = vsel %vm325_vm1, %v1045_v3, 0.0  ;;  %s601_s18 = sshll.u32 %s290_s17, 4  ;;  %s1170_s18 = int_to_ptr.vmem [resolvable:$true] %s601_s18 }
  0x1c   : > { %321 = vadd.xlane.f32.xlu0 %v319_v6  ;;  %s846_s29 = scalar_lea.vmem %s1170_s18, 256  ;;  %p853_p0 = scmp.lt.s32.totalorder %s1170_s18, %s851_s9 }
  0x1d   : > { %p847_p11 = scmp.ne.s32.totalorder %s1170_s18, %s846_s29  ;;  %p854_p1 = scmp.lt.s32.totalorder %s852_s13, %s846_s29 }
  0x1f   : > { %340 = vadd.xlane.f32.xlu1 %v337_v8  ;;  %p848_p12 = pnand %p847_p11, %p1021_p5  ;;  %p855_p2 = por %p854_p1, %p853_p0 }
  0x20   : > { %323 = vadd.xlane.f32.xlu0 %v320_v9 }
  0x21   : > { %p849_p13 = pneg %p848_p12 }
  0x23   : > { %334 = vadd.xlane.f32.xlu1 %v331_v10  ;;  %p856_p3 = pnand %p855_p2, %p849_p13 }
  0x24   : > { %332 = vadd.xlane.f32.xlu0 %v330_v11 }
  0x27   : > { %346 = vadd.xlane.f32.xlu1 %v343_v12 }
  0x28   : > { %344 = vadd.xlane.f32.xlu0 %v342_v13 }
  0xa4   : > { %v339_v14 = vpop.xlane.xlu1 %338 }
  0xa5   : > { %v322_v15 = vpop.xlane.xlu0 %321  ;;  %v368_v17 = vmul.f32 0.015625, %v339_v14  ;;  %v348_v14 = vld [vmem:[%s1269_s3] sm:$0x1] }
  0xa6   : > { %v353_v19 = vmul.f32 0.015625, %v322_v15 }
  0xa7   : > { %v370_v20 = vmul.f32 %v368_v17, %v351_v16 }
  0xa8   : > { %v355_v21 = vmul.f32 %v353_v19, %v349_v18  ;;  %v341_v23 = vpop.xlane.xlu1 %340 }
  0xa9   : > { %v324_v25 = vpop.xlane.xlu0 %323  ;;  %v369_v26 = vmul.f32 0.015625, %v341_v23  ;;  %v372_v30 = vsel %vm357_vm2, %v370_v20, 0.0 }
  0xaa   : > { %v354_v27 = vmul.f32 0.015625, %v324_v25  ;;  %v358_v31 = vsel %vm357_vm2, %v355_v21, 0.0  ;;  %v422_v25 = vshrl.u32 %v308_v0, 7  ;;  %v739_v0 = vld [vmem:[%s1270_s4 + $0x20] sm:$0xff] }
  0xab   : > { %v371_v28 = vmul.f32 %v369_v26, %v352_v22 }
  0xac   : > { %v356_v29 = vmul.f32 %v354_v27, %v350_v24  ;;  %v335_v33 = vpop.xlane.xlu1 %334 }
  0xad   : > { %v333_v35 = vpop.xlane.xlu0 %332  ;;  %v373_v36 = vsel %vm357_vm2, %v371_v28, 0.0  ;;  %v388_v38 = vmul.f32 0.015625, %v335_v33  ;;  %v416_v33 = vld [vmem:[%s1270_s4] sm:$0xff] }
  0xae   : > { %v359_v37 = vsel %vm357_vm2, %v356_v29, 0.0  ;;  %v387_v39 = vmul.f32 0.015625, %v333_v35  ;;  %v374_v40 = vadd.f32 %v373_v36, %v372_v30  ;;  %v423_v29 = vsub.s32 0, %v422_v25  ;;  %v740_v35 = vld [vmem:[%s1270_s4 + $0x28] sm:$0xff] }
  0xaf   : > { %v360_v41 = vadd.f32 %v359_v37, %v358_v31  ;;  %v390_v42 = vmul.f32 %v734_v32, %v388_v38  ;;  %v417_v32 = vld [vmem:[%s1270_s4 + $0x8] sm:$0xff] }
  0xb0   : > { %v389_v43 = vmul.f32 %v733_v34, %v387_v39  ;;  %v375_v44 = vrot.slane %v374_v40, 4  ;;  %v347_v47 = vpop.xlane.xlu1 %346 }
  0xb1   : > { %v361_v45 = vrot.slane %v360_v41, 4  ;;  %v345_v49 = vpop.xlane.xlu0 %344  ;;  %v392_v50 = vsel %vm357_vm2, %v390_v42, 0.0  ;;  %v402_v52 = vmul.f32 0.015625, %v347_v47  ;;  %v505_v42 = vld [vmem:[%s1270_s4 + $0x18] sm:$0xff] }
  0xb2   : > { %v391_v51 = vsel %vm357_vm2, %v389_v43, 0.0  ;;  %v401_v53 = vmul.f32 0.015625, %v345_v49  ;;  %v376_v54 = vadd.f32 %v375_v44, %v374_v40  ;;  %v504_v43 = vld [vmem:[%s1270_s4 + $0x10] sm:$0xff] }
  0xb3   : > { %v362_v55 = vadd.f32 %v361_v45, %v360_v41  ;;  %v393_v56 = vadd.f32 %v392_v50, %v391_v51  ;;  %v404_v57 = vmul.f32 %v736_v46, %v402_v52  ;;  %v747_v49 = vld [vmem:[%s1270_s4 + $0x30] sm:$0xff] }
  0xb4   : > { %v403_v58 = vmul.f32 %v735_v48, %v401_v53  ;;  %v377_v59 = vrot.slane %v376_v54, 2  ;;  %v748_v48 = vld [vmem:[%s1270_s4 + $0x38] sm:$0xff] }
  0xb5   : > { %v363_v60 = vrot.slane %v362_v55, 2  ;;  %v394_v61 = vrot.slane %v393_v56, 4  ;;  %v406_v62 = vsel %vm357_vm2, %v404_v57, 0.0  ;;  %v418_v57 = vld [vmem:[%s1271_s5] sm:$0xff] }
  0xb6   : > { %v405_v63 = vsel %vm357_vm2, %v403_v58, 0.0  ;;  %v378_v5 = vadd.f32 %v377_v59, %v376_v54 }
  0xb7   : > { %v364_v6 = vadd.f32 %v363_v60, %v362_v55  ;;  %v395_v8 = vadd.f32 %v394_v61, %v393_v56  ;;  %v407_v9 = vadd.f32 %v406_v62, %v405_v63  ;;  %v938_v56 = vmov 0   ;;  %v419_v61 = vld [vmem:[%s1271_s5 + $0x8] sm:$0xff]  ;;  %v741_v63 = vld [vmem:[%s1271_s5 + $0x20] sm:$0xff] }
  0xb8   : > { %v379_v10 = vrot.slane %v378_v5, 1  ;;  %813 = vset.pattern.permute.xlu1 %v938_v56  ;;  %812 = vset.pattern.permute.xlu0 %v938_v56  ;;  %v742_v62 = vld [vmem:[%s1271_s5 + $0x28] sm:$0xff] }
  0xb9   : > { %v365_v11 = vrot.slane %v364_v6, 1  ;;  %v396_v12 = vrot.slane %v395_v8, 2  ;;  %v408_v13 = vrot.slane %v407_v9, 4 }
  0xba   : > { %v380_v18 = vadd.f32 %v379_v10, %v378_v5 }
  0xbb   : > { %v366_v15 = vadd.f32 %v365_v11, %v364_v6  ;;  %v397_v16 = vadd.f32 %v396_v12, %v395_v8  ;;  %v409_v17 = vadd.f32 %v408_v13, %v407_v9 }
  0xbd   : > { %v367_v19 = vadd.f32 %v366_v15, %v348_v14  ;;  %v398_v20 = vrot.slane %v397_v16, 1  ;;  %v410_v21 = vrot.slane %v409_v17, 2 }
  0xbf   : > { %v381_v22 = vadd.f32 %v380_v18, %v367_v19  ;;  %v399_v23 = vadd.f32 %v398_v20, %v397_v16  ;;  %v411_v24 = vadd.f32 %v410_v21, %v409_v17  ;;  %v750_v17 = vld [vmem:[%s1271_s5 + $0x38] sm:$0xff]  ;;  %v749_v18 = vld [vmem:[%s1271_s5 + $0x30] sm:$0xff] }
  0xc0   : > { %v506_v21 = vld [vmem:[%s1271_s5 + $0x10] sm:$0xff] }
  0xc1   : > { %v412_v26 = vrot.slane %v411_v24, 1  ;;  %v400_v27 = vadd.f32 %v399_v23, %v381_v22 }
  0xc3   : > { %v413_v28 = vadd.f32 %v412_v26, %v411_v24  ;;  %v507_v26 = vld [vmem:[%s1271_s5 + $0x18] sm:$0xff] }
  0xc5   : > { %v414_v30 = vadd.f32 %v413_v28, %v400_v27 }
  0xc7   : > { %v415_v31 = vmax.f32 %v414_v30, 0.0 }
  0xc9   : > { %v424_v34 = vrot.slane %v415_v31, %v423_v29 }
  0xcb   : > { %v427_v36 = vmul.f32 %v424_v34, %v417_v32  ;;  %v426_v37 = vmul.f32 %v424_v34, %v416_v33  ;;  %v455_v40 = vmul.f32 %v740_v35, %v424_v34  ;;  %v454_v41 = vmul.f32 %v739_v0, %v424_v34 }
  0xcc   : > { %v509_v46 = vmul.f32 %v505_v42, %v424_v34  ;;  %v508_v47 = vmul.f32 %v504_v43, %v424_v34  ;;  %v535_v52 = vmul.f32 %v748_v48, %v424_v34  ;;  %v534_v53 = vmul.f32 %v747_v49, %v424_v34 }
  0xcd   : > { %v431_v38 = vsel %vm357_vm2, %v427_v36, 0.0  ;;  %v428_v39 = vsel %vm357_vm2, %v426_v37, 0.0  ;;  %v459_v44 = vsel %vm357_vm2, %v455_v40, 0.0  ;;  %v456_v45 = vsel %vm357_vm2, %v454_v41, 0.0 }
  0xce   : > { %432 = vadd.xlane.f32.xlu1 %v431_v38  ;;  %429 = vadd.xlane.f32.xlu0 %v428_v39  ;;  %v513_v50 = vsel %vm357_vm2, %v509_v46, 0.0  ;;  %v510_v51 = vsel %vm357_vm2, %v508_v47, 0.0  ;;  %v539_v54 = vsel %vm357_vm2, %v535_v52, 0.0  ;;  %v536_v55 = vsel %vm357_vm2, %v534_v53, 0.0 }
  0xd2   : > { %460 = vadd.xlane.f32.xlu1 %v459_v44  ;;  %457 = vadd.xlane.f32.xlu0 %v456_v45 }
  0xd6   : > { %514 = vadd.xlane.f32.xlu1 %v513_v50  ;;  %511 = vadd.xlane.f32.xlu0 %v510_v51 }
  0xda   : > { %540 = vadd.xlane.f32.xlu1 %v539_v54  ;;  %537 = vadd.xlane.f32.xlu0 %v536_v55 }
 0x157   : > { %v433_v58 = vpop.xlane.xlu1 %432  ;;  %v430_v59 = vpop.xlane.xlu0 %429 }
 0x158   : > { %v434_v60 = vadd.f32 %v430_v59, %v418_v57  ;;  %v435_v9 = vadd.f32 %v433_v58, %v419_v61 }
 0x15a   : > { %v737_v5 = vmul.f32 -1.442695, %v434_v60  ;;  %v738_v16 = vmul.f32 -1.442695, %v435_v9 }
 0x15b   : > { %v461_v6 = vpop.xlane.xlu1 %460  ;;  %v458_v8 = vpop.xlane.xlu0 %457 }
 0x15c   : > { %v463_v10 = vadd.f32 %v742_v62, %v461_v6  ;;  %v462_v11 = vadd.f32 %v741_v63, %v458_v8  ;;  %814 = vpow2.f32 %v737_v5 }
 0x15e   : > { %v744_v12 = vmul.f32 -1.442695, %v463_v10  ;;  %v743_v13 = vmul.f32 -1.442695, %v462_v11 }
 0x15f   : > { %v515_v14 = vpop.xlane.xlu1 %514  ;;  %v512_v15 = vpop.xlane.xlu0 %511 }
 0x160   : > { %816 = vpow2.f32 %v744_v12  ;;  %v516_v25 = vadd.f32 %v512_v15, %v506_v21  ;;  %v517_v28 = vadd.f32 %v515_v14, %v507_v26 }
 0x161   : > { %818 = vpow2.f32 %v743_v13 }
 0x162   : > { %820 = vpow2.f32 %v738_v16  ;;  %v745_v29 = vmul.f32 -1.442695, %v516_v25  ;;  %v746_v35 = vmul.f32 -1.442695, %v517_v28 }
 0x163   : > { %v541_v19 = vpop.xlane.xlu1 %540  ;;  %v538_v20 = vpop.xlane.xlu0 %537 }
 0x164   : > { %v543_v22 = vadd.f32 %v750_v17, %v541_v19  ;;  %v542_v23 = vadd.f32 %v749_v18, %v538_v20 }
 0x166   : > { %v751_v24 = vmul.f32 -1.442695, %v542_v23  ;;  %v752_v27 = vmul.f32 -1.442695, %v543_v22 }
 0x168   : > { %822 = vpow2.f32 %v751_v24 }
 0x169   : > { %v815_v30 = vpop.eup %814  ;;  %824 = vpow2.f32 %v752_v27 }
 0x16a   : > { %826 = vpow2.f32 %v745_v29  ;;  %v442_v0 = vadd.f32 1.0, %v815_v30 }
 0x16d   : > { %v817_v31 = vpop.eup %816 }
 0x16e   : > { %v819_v32 = vpop.eup %818  ;;  %v471_v33 = vadd.f32 1.0, %v817_v31 }
 0x16f   : > { %v470_v34 = vadd.f32 1.0, %v819_v32  ;;  %v821_v36 = vpop.eup %820 }
 0x170   : > { %828 = vrcp.f32 %v471_v33  ;;  %v443_v37 = vadd.f32 1.0, %v821_v36 }
 0x171   : > { %830 = vrcp.f32 %v470_v34 }
 0x172   : > { %832 = vpow2.f32 %v746_v35 }
 0x173   : > { %834 = vrcp.f32 %v442_v0 }
 0x174   : > { %836 = vrcp.f32 %v443_v37 }
 0x175   : > { %v823_v38 = vpop.eup %822 }
 0x176   : > { %v550_v39 = vadd.f32 1.0, %v823_v38  ;;  %v825_v40 = vpop.eup %824 }
 0x177   : > { %v827_v41 = vpop.eup %826  ;;  %v551_v42 = vadd.f32 1.0, %v825_v40 }
 0x178   : > { %838 = vrcp.f32 %v550_v39  ;;  %v524_v46 = vadd.f32 1.0, %v827_v41 }
 0x179   : > { %840 = vrcp.f32 %v551_v42 }
 0x17a   : > { %842 = vrcp.f32 %v524_v46 }
 0x17d   : > { %v829_v43 = vpop.eup %828 }
 0x17e   : > { %v831_v44 = vpop.eup %830  ;;  %485 = vperm.xlu1 %813, %v829_v43  }
 0x17f   : > { %480 = vperm.xlu0 %812, %v831_v44   ;;  %v833_v45 = vpop.eup %832 }
 0x180   : > { %v835_v47 = vpop.eup %834  ;;  %v525_v48 = vadd.f32 1.0, %v833_v45 }
 0x181   : > { %v837_v49 = vpop.eup %836 }
 0x182   : > { %490 = vperm.xlu1 %813, %v835_v47   ;;  %844 = vrcp.f32 %v525_v48 }
 0x185   : > { %v839_v50 = vpop.eup %838 }
 0x186   : > { %495 = vperm.xlu1 %813, %v837_v49   ;;  %v841_v51 = vpop.eup %840 }
 0x187   : > { %v843_v52 = vpop.eup %842 }
 0x18a   : > { %558 = vperm.xlu1 %813, %v839_v50  }
 0x18e   : > { %563 = vperm.xlu1 %813, %v841_v51  }
 0x18f   : > { %v845_v53 = vpop.eup %844 }
 0x192   : > { %568 = vperm.xlu1 %813, %v843_v52  }
 0x196   : > { %573 = vperm.xlu1 %813, %v845_v53  }
 0x1f9   : > { %v486_v54 = vpop.permute.xlu1 %485 }
 0x1fa   : > { %v481_v55 = vpop.permute.xlu0 %480 }
 0x1fd   : > { %v491_v56 = vpop.permute.xlu1 %490 }
 0x1fe   : > { %v498_v57 = vsel %vm325_vm1, %v481_v55, %v491_v56 }
 0x1ff   : > { %v500_v58 = vmul.f32 %v498_v57, %v1045_v3 }
 0x201   : > { %502 = vst [vmem:[%s290_s17] sm:$0xff] %v500_v58  ;;  %v496_v59 = vpop.permute.xlu1 %495 }
 0x202   : > { %v499_v60 = vsel %vm325_vm1, %v486_v54, %v496_v59 }
 0x203   : > { %v501_v61 = vmul.f32 %v499_v60, %v1051_v7 }
 0x205   : > { %503 = vst [vmem:[%s290_s17 + $0x8] sm:$0xff] %v501_v61  ;;  %v559_v3 = vpop.permute.xlu1 %558 }
 0x206   : > { %859 = shalt.err (!%p856_p3)
}
 0x207   : > { %s860_s14 = scalar_lea.hbm %s1179_s22, 256  ;;  %s864_s21 = scalar_lea.hbm %s1272_s6, 512 }
 0x208   : > { %p861_p4 = scmp.ne.s32.totalorder %s1179_s22, %s860_s14  ;;  %p865_p9 = scmp.lt.s32.totalorder %s1179_s22, %s1272_s6 }
 0x209   : > { %p866_p10 = scmp.lt.s32.totalorder %s864_s21, %s860_s14 }
 0x20a   : > { %p862_p7 = pnand %p861_p4, %p1021_p5 }
 0x20b   : > { %p867_p11 = por %p866_p10, %p865_p9 }
 0x20c   : > { %p863_p8 = pneg %p862_p7 }
 0x20e   : > { %p868_p12 = pnand %p867_p11, %p863_p8 }
 0x210   : > { %871 = shalt.err (!%p868_p12)
}
 0x211   : > { %s940_s29 = smov 128   ;;  %s941_s9 = smov 8   ;;  %v564_v7 = vpop.permute.xlu1 %563 }
 0x212   : > { %765 = dma.vmem_to_hbm [thread:$0]  (%p1021_p5), %s1170_s18, 256, %s1179_s22, %s583_s23, %s940_s29, %s940_s29, %s941_s9  }
 0x213   : > { %s297_s19 = scalar_lea.vmem [#allocation4], %s727_s16  ;;  %s1277_s18 = sshll.u32 %s1004_s28, 8 }
 0x214   : > { %s617_s13 = sshll.u32 %s297_s19, 4  ;;  %s1223_s14 = scalar_lea.hbm %s1273_s7, %s1277_s18  ;;  %s1213_s13 = int_to_ptr.vmem [resolvable:$true] %s617_s13 }
 0x215   : > { %v569_v62 = vpop.permute.xlu1 %568  ;;  %s588_s16 = scalar_lea.sflag [#allocation5], %s1161_s15  ;;  %s872_s17 = scalar_lea.vmem %s1213_s13, 256 }
 0x216   : > { %v576_v63 = vsel %vm325_vm1, %v559_v3, %v569_v62  ;;  %p873_p13 = scmp.ne.s32.totalorder %s1213_s13, %s872_s17  ;;  %s942_s20 = smov [#allocation4]  }
 0x217   : > { %v578_v5 = vmul.f32 %v576_v63, %v1043_v2  ;;  %s876_s21 = sshll.u32 %s942_s20, 4  ;;  %s877_s21 = int_to_ptr.vmem [resolvable:$false] %s876_s21 }
 0x218   : > { %p874_p0 = pnand %p873_p13, %p1021_p5  ;;  %s878_s8 = scalar_lea.vmem %s877_s21, 512 }
 0x219   : > { %580 = vst [vmem:[%s297_s19] sm:$0xff] %v578_v5  ;;  %v574_v6 = vpop.permute.xlu1 %573  ;;  %p879_p2 = scmp.lt.s32.totalorder %s1213_s13, %s877_s21  ;;  %p880_p3 = scmp.lt.s32.totalorder %s878_s8, %s872_s17 }
 0x21a   : > { %v577_v8 = vsel %vm325_vm1, %v564_v7, %v574_v6  ;;  %p875_p1 = pneg %p874_p0 }
 0x21b   : > { %v579_v9 = vmul.f32 %v577_v8, %v1047_v4  ;;  %p881_p4 = por %p880_p3, %p879_p2 }
 0x21d   : > { %581 = vst [vmem:[%s297_s19 + $0x8] sm:$0xff] %v579_v9  ;;  %p882_p7 = pnand %p881_p4, %p875_p1 }
 0x21f   : > { %885 = shalt.err (!%p882_p7)
}
 0x220   : > { %s886_s28 = scalar_lea.hbm %s1223_s14, 256  ;;  %s890_s18 = scalar_lea.hbm %s1273_s7, 512 }
 0x221   : > { %p887_p8 = scmp.ne.s32.totalorder %s1223_s14, %s886_s28  ;;  %p891_p11 = scmp.lt.s32.totalorder %s1223_s14, %s1273_s7 }
 0x222   : > { %p892_p12 = scmp.lt.s32.totalorder %s890_s18, %s886_s28 }
 0x223   : > { %p888_p9 = pnand %p887_p8, %p1021_p5 }
 0x224   : > { %p893_p13 = por %p892_p12, %p891_p11 }
 0x225   : > { %p889_p10 = pneg %p888_p9 }
 0x227   : > { %p894_p0 = pnand %p893_p13, %p889_p10 }
 0x229   : > { %897 = shalt.err (!%p894_p0)
}
 0x22a   : > { %766 = dma.vmem_to_hbm [thread:$0]  (%p1021_p5), %s1213_s13, 256, %s1223_s14, %s588_s16, %s940_s29, %s940_s29, %s941_s9  }
 0x22b PF: > { %p776_p1 = scmp.ge.s32.totalorder %s936_s27, 2  ;;  %s632_s17 = sand.u32 1, %s924_s24  }
 0x22c   : > { %s633_s20 = scalar_lea.sflag [#allocation3], %s632_s17 }
 0x22d   : > { %p770_p2 = pnand %p776_p1, %p1025_p6 }
 0x22f   : > { %p771_p3 = pneg %p770_p2 }
 0x231   : > { %915 = dma.done.wait (%p771_p3), %s633_s20, 256  }
 0x232   : > { %917 = vsyncadd (%p771_p3), %s633_s20, 4294967040  ;;  %s642_s21 = scalar_lea.sflag [#allocation5], %s632_s17 }
 0x233   : > { %919 = dma.done.wait (%p771_p3), %s642_s21, 256  }
 0x234   : > { %921 = vsyncadd (%p771_p3), %s642_s21, 4294967040  ;;  %p21_p5 = scmp.ge.s32.totalorder %s1008_s30, 4   ;;  %s1278_s24 = smov %s928_s25 }
 0x235   : > { %s1279_s25 = smov %s932_s26  ;;  %s1280_s26 = smov %s1019_s10 }
 0x236   : > { %s1281_s27 = smov %s1008_s30  ;;  %23 = sbr.rel (!%p21_p5) target bundleno = 5 (0x5), region = 102 }
 0x23b   :  { %647 = vsyncpa [#allocation3], 1 }
 0x23c   :  { %649 = vsyncpa [#allocation3 + $0x1], 1 }
 0x23d   :  { %650 = vsyncpa [#allocation5], 1 }
 0x23e   :  { %652 = vsyncpa [#allocation5 + $0x1], 1 }

</bundles_post_ra>
